<compile_context>
chip_gen: v5e
topology: v5e:2x2
jax: 0.10.0
libtpu: 0.0.40
codegen_flags: <defaults>
</compile_context>

<pallas_src>
import jax
import jax.numpy as jnp
from jax.experimental import pallas as pl
from jax.experimental.pallas import tpu as pltpu


def _round_up(x, m):
    return ((x + m - 1) // m) * m


def _actor_kernel(x_ref, w1_ref, b1_ref, w2_ref, b2_ref, w3_ref, b3_ref, o_ref):
    """One batch tile: out = relu(relu(relu(x@W1+b1)@W2+b2)@W3+b3)."""
    x = x_ref[...]
    # Layer 1: MXU matmul with f32 accumulation, f32 epilogue.
    h1 = jnp.dot(x, w1_ref[...], preferred_element_type=jnp.float32)
    h1 = jnp.maximum(h1 + b1_ref[...], 0.0).astype(w2_ref.dtype)
    # Layer 2
    h2 = jnp.dot(h1, w2_ref[...], preferred_element_type=jnp.float32)
    h2 = jnp.maximum(h2 + b2_ref[...], 0.0).astype(w3_ref.dtype)
    # Layer 3 (+ final ReLU, matching torch.relu in the reference module)
    h3 = jnp.dot(h2, w3_ref[...], preferred_element_type=jnp.float32)
    o_ref[...] = jnp.maximum(h3 + b3_ref[...], 0.0)


def actor_forward(state, params, *, block_b=1024, compute_dtype=jnp.bfloat16):
    """state: [B, input_size] f32 -> [B, output_size] f32."""
    w1, b1 = params["w1"], params["b1"]
    w2, b2 = params["w2"], params["b2"]
    w3, b3 = params["w3"], params["b3"]

    B, in_size = state.shape
    out_size = w3.shape[1]

    # Batch tile: multiple of 8 sublanes, capped at block_b. Pad B up to a
    # multiple of the tile so every block is full (padding sliced off below).
    tb = min(block_b, _round_up(max(B, 1), 8))
    b_pad = _round_up(max(B, 1), tb)
    if b_pad != B:
        state = jnp.pad(state, ((0, b_pad - B), (0, 0)))

    # Cast the streamed input and the weights to the MXU compute dtype;
    # biases stay f32 (epilogue is f32 on all generations).
    x = state.astype(compute_dtype)
    w1c, w2c, w3c = (w.astype(compute_dtype) for w in (w1, w2, w3))
    b1f, b2f, b3f = (b.astype(jnp.float32).reshape(1, -1) for b in (b1, b2, b3))

    grid = (b_pad // tb,)

    def resident(a):  # whole-array block, never re-fetched across the grid
        return pl.BlockSpec(a.shape, lambda i: (0, 0))

    out = pl.pallas_call(
        _actor_kernel,
        out_shape=jax.ShapeDtypeStruct((b_pad, out_size), jnp.float32),
        grid=grid,
        in_specs=[
            pl.BlockSpec((tb, in_size), lambda i: (i, 0)),   # x: streamed per tile
            resident(w1c), resident(b1f),
            resident(w2c), resident(b2f),
            resident(w3c), resident(b3f),
        ],
        out_specs=pl.BlockSpec((tb, out_size), lambda i: (i, 0)),
        compiler_params=pltpu.CompilerParams(
            dimension_semantics=("parallel",),   # shard batch tiles across TCs (v7x)
        ),
    )(x, w1c, b1f, w2c, b2f, w3c, b3f)

    return out[:B]


def init_actor_params(key, input_size, hidden_size, output_size):
    """PyTorch nn.Linear-style init (uniform +/- 1/sqrt(fan_in)).
    Weights stored as [in, out] (transposed vs PyTorch's [out, in])."""
    ks = jax.random.split(key, 6)

    def lin(kw, kb, fan_in, fan_out):
        bound = 1.0 / jnp.sqrt(fan_in)
        w = jax.random.uniform(kw, (fan_in, fan_out), jnp.float32, -bound, bound)
        b = jax.random.uniform(kb, (1, fan_out), jnp.float32, -bound, bound)
        return w, b

    w1, b1 = lin(ks[0], ks[1], input_size, hidden_size)
    w2, b2 = lin(ks[2], ks[3], hidden_size, hidden_size)
    w3, b3 = lin(ks[4], ks[5], hidden_size, output_size)
    return {"w1": w1, "b1": b1, "w2": w2, "b2": b2, "w3": w3, "b3": b3}


def actor_reference(state, params, dtype=jnp.float32):
    """Pure-JAX reference. dtype controls the matmul input precision so we can
    check bit-for-bit against the kernel's mixed-precision math."""
    w1, w2, w3 = (params[k].astype(dtype) for k in ("w1", "w2", "w3"))
    b1, b2, b3 = params["b1"], params["b2"], params["b3"]
    x = state.astype(dtype)
    h = jnp.maximum(jnp.dot(x, w1, preferred_element_type=jnp.float32) + b1, 0.0)
    h = jnp.maximum(jnp.dot(h.astype(dtype), w2,
                            preferred_element_type=jnp.float32) + b2, 0.0)
    h = jnp.dot(h.astype(dtype), w3, preferred_element_type=jnp.float32) + b3
    return jnp.maximum(h, 0.0)


if __name__ == "__main__":
    key = jax.random.PRNGKey(0)
    k_param, k_state, k_big = jax.random.split(key, 3)

    input_size, hidden_size, output_size = 16, 32, 8
    params = init_actor_params(k_param, input_size, hidden_size, output_size)

    # Small case (matches the module's intended usage: state [B, input_size]).
    batch = 2
    state = jax.random.normal(k_state, (batch, input_size), jnp.float32)
    out = jax.block_until_ready(actor_forward(state, params))
    assert out.shape == (batch, output_size)

    ref_bf16 = actor_reference(state, params, dtype=jnp.bfloat16)  # same math as kernel
    ref_f32 = actor_reference(state, params, dtype=jnp.float32)    # exact module math
    assert jnp.allclose(out, ref_bf16, atol=1e-4, rtol=1e-4), "mismatch vs bf16 reference"
    assert jnp.allclose(out, ref_f32, atol=5e-2, rtol=5e-2), "mismatch vs f32 reference"

    # Larger, non-tile-multiple batch to exercise the pipelined multi-tile grid
    # and the padding/slicing path.
    big_b = 300
    state_big = jax.random.normal(k_big, (big_b, input_size), jnp.float32)
    out_big = jax.block_until_ready(actor_forward(state_big, params, block_b=128))
    ref_big = actor_reference(state_big, params, dtype=jnp.bfloat16)
    assert out_big.shape == (big_b, output_size)
    assert jnp.allclose(out_big, ref_big, atol=1e-4, rtol=1e-4), "mismatch (tiled path)"

    print("KERNEL_OK")
</pallas_src>

<mosaic_0001>
module attributes {stable_mosaic.version = 11 : i64} {
  func.func @_actor_kernel(%arg0: i32, %arg1: memref<8x16xbf16, #tpu.memory_space<vmem>>, %arg2: memref<16x32xbf16, #tpu.memory_space<vmem>>, %arg3: memref<1x32xf32, #tpu.memory_space<vmem>>, %arg4: memref<32x32xbf16, #tpu.memory_space<vmem>>, %arg5: memref<1x32xf32, #tpu.memory_space<vmem>>, %arg6: memref<32x8xbf16, #tpu.memory_space<vmem>>, %arg7: memref<1x8xf32, #tpu.memory_space<vmem>>, %arg8: memref<8x8xf32, #tpu.memory_space<vmem>>) attributes {dimension_semantics = [#tpu.dimension_semantics<parallel>], iteration_bounds = array<i64: 1>, scalar_prefetch = 0 : i64, scratch_operands = 0 : i64, tpu.core_type = #tpu.core_type<tc>, window_params = [{transform_indices = @transform_0, window_bounds = array<i64: 8, 16>}, {pipeline_mode = #tpu.pipeline_mode<synchronous>, transform_indices = @transform_1, window_bounds = array<i64: 16, 32>}, {pipeline_mode = #tpu.pipeline_mode<synchronous>, transform_indices = @transform_2, window_bounds = array<i64: 1, 32>}, {pipeline_mode = #tpu.pipeline_mode<synchronous>, transform_indices = @transform_3, window_bounds = array<i64: 32, 32>}, {pipeline_mode = #tpu.pipeline_mode<synchronous>, transform_indices = @transform_4, window_bounds = array<i64: 1, 32>}, {pipeline_mode = #tpu.pipeline_mode<synchronous>, transform_indices = @transform_5, window_bounds = array<i64: 32, 8>}, {pipeline_mode = #tpu.pipeline_mode<synchronous>, transform_indices = @transform_6, window_bounds = array<i64: 1, 8>}, {transform_indices = @transform_7, window_bounds = array<i64: 8, 8>}]} {
    %c0 = arith.constant 0 : index
    %c0_0 = arith.constant 0 : index
    %0 = vector.load %arg1[%c0, %c0_0] : memref<8x16xbf16, #tpu.memory_space<vmem>>, vector<8x16xbf16>
    %c0_1 = arith.constant 0 : index
    %c0_2 = arith.constant 0 : index
    %1 = vector.load %arg2[%c0_1, %c0_2] : memref<16x32xbf16, #tpu.memory_space<vmem>>, vector<16x32xbf16>
    %cst = arith.constant dense<0.000000e+00> : vector<8x32xf32>
    %2 = tpu.matmul %0, %1, %cst {dimension_numbers = #tpu.dot_dimension_numbers<[1], [0], [0], [1], [0, 0, 1, 1], [], []>} : vector<8x16xbf16>, vector<16x32xbf16>, vector<8x32xf32> -> vector<8x32xf32>
    %c0_3 = arith.constant 0 : index
    %c0_4 = arith.constant 0 : index
    %3 = vector.load %arg3[%c0_3, %c0_4] : memref<1x32xf32, #tpu.memory_space<vmem>>, vector<1x32xf32>
    %4 = vector.broadcast %3 : vector<1x32xf32> to vector<8x32xf32>
    %5 = arith.addf %2, %4 : vector<8x32xf32>
    %cst_5 = arith.constant 0.000000e+00 : f32
    %6 = vector.broadcast %cst_5 : f32 to vector<8x32xf32>
    %7 = arith.maximumf %5, %6 : vector<8x32xf32>
    %8 = arith.truncf %7 : vector<8x32xf32> to vector<8x32xbf16>
    %c0_6 = arith.constant 0 : index
    %c0_7 = arith.constant 0 : index
    %9 = vector.load %arg4[%c0_6, %c0_7] : memref<32x32xbf16, #tpu.memory_space<vmem>>, vector<32x32xbf16>
    %cst_8 = arith.constant dense<0.000000e+00> : vector<8x32xf32>
    %10 = tpu.matmul %8, %9, %cst_8 {dimension_numbers = #tpu.dot_dimension_numbers<[1], [0], [0], [1], [0, 0, 1, 1], [], []>} : vector<8x32xbf16>, vector<32x32xbf16>, vector<8x32xf32> -> vector<8x32xf32>
    %c0_9 = arith.constant 0 : index
    %c0_10 = arith.constant 0 : index
    %11 = vector.load %arg5[%c0_9, %c0_10] : memref<1x32xf32, #tpu.memory_space<vmem>>, vector<1x32xf32>
    %12 = vector.broadcast %11 : vector<1x32xf32> to vector<8x32xf32>
    %13 = arith.addf %10, %12 : vector<8x32xf32>
    %cst_11 = arith.constant 0.000000e+00 : f32
    %14 = vector.broadcast %cst_11 : f32 to vector<8x32xf32>
    %15 = arith.maximumf %13, %14 : vector<8x32xf32>
    %16 = arith.truncf %15 : vector<8x32xf32> to vector<8x32xbf16>
    %c0_12 = arith.constant 0 : index
    %c0_13 = arith.constant 0 : index
    %17 = vector.load %arg6[%c0_12, %c0_13] : memref<32x8xbf16, #tpu.memory_space<vmem>>, vector<32x8xbf16>
    %cst_14 = arith.constant dense<0.000000e+00> : vector<8x8xf32>
    %18 = tpu.matmul %16, %17, %cst_14 {dimension_numbers = #tpu.dot_dimension_numbers<[1], [0], [0], [1], [0, 0, 1, 1], [], []>} : vector<8x32xbf16>, vector<32x8xbf16>, vector<8x8xf32> -> vector<8x8xf32>
    %c0_15 = arith.constant 0 : index
    %c0_16 = arith.constant 0 : index
    %19 = vector.load %arg7[%c0_15, %c0_16] : memref<1x8xf32, #tpu.memory_space<vmem>>, vector<1x8xf32>
    %20 = vector.broadcast %19 : vector<1x8xf32> to vector<8x8xf32>
    %21 = arith.addf %18, %20 : vector<8x8xf32>
    %cst_17 = arith.constant 0.000000e+00 : f32
    %22 = vector.broadcast %cst_17 : f32 to vector<8x8xf32>
    %23 = arith.maximumf %21, %22 : vector<8x8xf32>
    %c0_18 = arith.constant 0 : index
    %c0_19 = arith.constant 0 : index
    %24 = vector.load %arg8[%c0_18, %c0_19] : memref<8x8xf32, #tpu.memory_space<vmem>>, vector<8x8xf32>
    tpu.vector_store %arg8[%c0_18, %c0_19], %23 {strides = array<i32>} : memref<8x8xf32, #tpu.memory_space<vmem>>, vector<8x8xf32>,
    return
  }
  func.func @transform_0(%arg0: i32) -> (i32, i32) {
    %c0_i32 = arith.constant 0 : i32
    %c0_i32_0 = arith.constant 0 : i32
    return %arg0, %c0_i32 : i32, i32
  }
  func.func @transform_1(%arg0: i32) -> (i32, i32) {
    %c0_i32 = arith.constant 0 : i32
    %c0_i32_0 = arith.constant 0 : i32
    %c0_i32_1 = arith.constant 0 : i32
    return %c0_i32, %c0_i32_0 : i32, i32
  }
  func.func @transform_2(%arg0: i32) -> (i32, i32) {
    %c0_i32 = arith.constant 0 : i32
    %c0_i32_0 = arith.constant 0 : i32
    %c0_i32_1 = arith.constant 0 : i32
    return %c0_i32, %c0_i32_0 : i32, i32
  }
  func.func @transform_3(%arg0: i32) -> (i32, i32) {
    %c0_i32 = arith.constant 0 : i32
    %c0_i32_0 = arith.constant 0 : i32
    %c0_i32_1 = arith.constant 0 : i32
    return %c0_i32, %c0_i32_0 : i32, i32
  }
  func.func @transform_4(%arg0: i32) -> (i32, i32) {
    %c0_i32 = arith.constant 0 : i32
    %c0_i32_0 = arith.constant 0 : i32
    %c0_i32_1 = arith.constant 0 : i32
    return %c0_i32, %c0_i32_0 : i32, i32
  }
  func.func @transform_5(%arg0: i32) -> (i32, i32) {
    %c0_i32 = arith.constant 0 : i32
    %c0_i32_0 = arith.constant 0 : i32
    %c0_i32_1 = arith.constant 0 : i32
    return %c0_i32, %c0_i32_0 : i32, i32
  }
  func.func @transform_6(%arg0: i32) -> (i32, i32) {
    %c0_i32 = arith.constant 0 : i32
    %c0_i32_0 = arith.constant 0 : i32
    %c0_i32_1 = arith.constant 0 : i32
    return %c0_i32, %c0_i32_0 : i32, i32
  }
  func.func @transform_7(%arg0: i32) -> (i32, i32) {
    %c0_i32 = arith.constant 0 : i32
    %c0_i32_0 = arith.constant 0 : i32
    return %arg0, %c0_i32 : i32, i32
  }
}

</mosaic_0001>

<bundles_post_ra>
// kernel: tpu_custom_call.1
= control target key start
LH: loop header
LB: loop body
LE: loop exit
PB: predicated region body
PF: predicated region fallthrough
CT: control target
= control target key end

     0   :  { %12 = vsyncpa [#allocation3], 0  ;;  %s414_s0 = inlined_call_operand.vmem [shape: bf16[8,16], index: 0, kind: input, shape index: {}]   ;;  %s415_s1 = inlined_call_operand.hbm [shape: bf16[16,32], index: 1, kind: input, shape index: {}]   ;;  %s416_s2 = inlined_call_operand.hbm [shape: f32[1,32], index: 2, kind: input, shape index: {}]   ;;  %s417_s3 = inlined_call_operand.vmem [shape: bf16[32,32], index: 3, kind: input, shape index: {}]   ;;  %s418_s4 = inlined_call_operand.hbm [shape: f32[1,32], index: 4, kind: input, shape index: {}]   ;;  %s419_s5 = inlined_call_operand.vmem [shape: bf16[32,8], index: 5, kind: input, shape index: {}]   ;;  %s420_s6 = inlined_call_operand.vmem [shape: f32[1,8], index: 6, kind: input, shape index: {}]   ;;  %s421_s7 = inlined_call_operand.hbm [shape: f32[8,8], index: 7, kind: output, shape index: {}]  }
   0x1   :  { %13 = vsyncpa [#allocation6], 0  ;;  %s35_s26 = sshll.u32 %s416_s2, 4  ;;  %s36_s26 = int_to_ptr.hbm [resolvable:$true] %s35_s26 }
   0x2   :  { %14 = vsyncpa [#allocation4], 0  ;;  %s338_s27 = smov [#allocation5]   ;;  %s21_s8 = sshll.u32 %s415_s1, 4  ;;  %s22_s8 = int_to_ptr.hbm [resolvable:$true] %s21_s8 }
   0x3   :  { %s37_s28 = sshll.u32 %s338_s27, 4  ;;  %s339_s9 = smov [#allocation2]   ;;  %s38_s28 = int_to_ptr.vmem [resolvable:$true] %s37_s28 }
   0x4   :  { %40 = dma.hbm_to_vmem [thread:$0]  %s36_s26, 16, %s38_s28, [#allocation6]  }
   0x5   :  { %s23_s10 = sshll.u32 %s339_s9, 4  ;;  %s340_s11 = smov 64   ;;  %s24_s10 = int_to_ptr.vmem [resolvable:$true] %s23_s10 }
   0x6   :  { %s341_s12 = smov 4   ;;  %s48_s2 = sshll.u32 %s418_s4, 4  ;;  %s49_s2 = int_to_ptr.hbm [resolvable:$true] %s48_s2 }
   0x7   :  { %29 = dma.hbm_to_vmem [thread:$0]  %s22_s8, 128, %s24_s10, [#allocation3], %s340_s11, %s340_s11, %s341_s12  }
   0x8   :  { %s342_s15 = smov [#allocation7]  }
   0x9   :  { %s50_s16 = sshll.u32 %s342_s15, 4  ;;  %s51_s16 = int_to_ptr.vmem [resolvable:$true] %s50_s16 }
   0xa   :  { %53 = dma.hbm_to_vmem [thread:$0]  %s49_s2, 16, %s51_s16, [#allocation6]  }
   0xb   :  { %332 = dma.done.wait [#allocation3], 128  }
   0xc   :  { %333 = vsyncadd [#allocation3], 4294967168 }
   0xd   :  { %334 = dma.done.wait [#allocation6], 32  }
   0xe   :  { %335 = vsyncadd [#allocation6], 4294967264  ;;  %v222_v0 = vld [vmem:[#allocation2] sm:$0xff]  ;;  %vm84_vm0 = vcmask 130048   ;;  %v224_v2 = vld [vmem:[%s417_s3 + $0x8] sm:$0xff]  ;;  %vm123_vm1 = vcmask 261120  }
   0xf   :  { %95 = vmatpush.bf16.msra.mxu0 %v222_v0  ;;  %v71_v1 = vld [vmem:[%s414_s0] sm:$0xf]  ;;  %133 = vmatpush.bf16.msra.mxu1 %v224_v2  ;;  %v233_v4 = vld [vmem:[#allocation5] ss:$0 sm:$0xff]  ;;  %v234_v12 = vld [vmem:[#allocation7] ss:$0 sm:$0xff] }
  0x10   :  { %v223_v3 = vld [vmem:[%s417_s3] sm:$0xff]  ;;  %v226_v10 = vld [vmem:[%s419_s5 + $0x8] sm:$0xff]  ;;  %s343_s25 = smov [#allocation8]   ;;  %s188_s29 = sshll.u32 %s421_s7, 4  ;;  %vm179_vm2 = vcmask 64512   ;;  %s189_s29 = int_to_ptr.hbm [resolvable:$true] %s188_s29 }
  0x11   :  { %171 = vmatpush.bf16.msra.mxu2 %v226_v10  ;;  %v225_v11 = vld [vmem:[%s419_s5] sm:$0xff]  ;;  %s186_s26 = sshll.u32 %s343_s25, 4  ;;  %s187_s26 = int_to_ptr.vmem [resolvable:$true] %s186_s26 }
  0x12   :  { %203 = vmatmul.msk.bf16.vlgmr.msra.gmra.mxu0 %vm84_vm0, %v71_v1  ;;  %v235_v18 = vld [vmem:[%s420_s6] ss:$0 sm:$0xff] }
  0x13   :  { %134 = vmatpush.bf16.msra.mxu1 %v223_v3 }
  0x15   :  { %172 = vmatpush.bf16.msra.mxu2 %v225_v11 }
  0x8f   :  { %v97_v5 = vpop.f32.mrf.mxu0 }
  0x90   :  { %v98_v6 = vadd.f32 %v233_v4, %v97_v5 }
  0x92   :  { %v101_v7 = vmax.f32 %v98_v6, 0.0 }
  0x94   :  { %v102_v8 = vpack.c.bf16 %v101_v7, %v101_v7 }
  0x96   :  { %212 = vmatmul.msk.bf16.vlgmr.msra.gmra.mxu1 %vm123_vm1, %v102_v8 }
  0x97   :  { %v99_v9 = vpop.f32.mrf.mxu0 }
 0x113   :  { %v136_v13 = vpop.f32.mrf.mxu1 }
 0x114   :  { %v137_v14 = vadd.f32 %v234_v12, %v136_v13 }
 0x116   :  { %v140_v15 = vmax.f32 %v137_v14, 0.0 }
 0x118   :  { %v141_v16 = vpack.c.bf16 %v140_v15, %v140_v15 }
 0x11a   :  { %221 = vmatmul.msk.bf16.vlgmr.msra.gmra.mxu2 %vm123_vm1, %v141_v16 }
 0x11b   :  { %v138_v17 = vpop.f32.mrf.mxu1 }
 0x19d   :  { %v174_v19 = vpop.f32.mrf.mxu2 }
 0x19e   :  { %v175_v20 = vadd.f32 %v235_v18, %v174_v19 }
 0x1a0   :  { %v178_v21 = vmax.f32 %v175_v20, 0.0 }
 0x1a2   :  { %180 = vst.msk [vmem:[#allocation8] sm:$0xff] %vm179_vm2, %v178_v21 }
 0x1a3   :  { %191 = dma.vmem_to_hbm [thread:$0]  %s187_s26, 128, %s189_s29, [#allocation4]  }
 0x1a5   :  { %v176_v22 = vpop.f32.mrf.mxu2 }
 0x1a6   :  { %336 = dma.done.wait [#allocation4], 128  }
 0x1a7   :  { %337 = vsyncadd [#allocation4], 4294967168 }
 0x1a8   :  { %196 = vsyncpa [#allocation3], 1 }
 0x1a9   :  { %197 = vsyncpa [#allocation6], 1 }
 0x1aa   :  { %198 = vsyncpa [#allocation4], 1 }

</bundles_post_ra>
